<compile_context>
chip_gen: v6e
topology: v6e:2x2x1
jax: 0.10.0
libtpu: 0.0.40
codegen_flags: <defaults>
</compile_context>

<pallas_src>
import jax
import jax.numpy as jnp
from jax import lax
from jax.experimental import pallas as pl
from jax.experimental.pallas import tpu as pltpu

IN_FEATURES = 2400
HIDDEN = 100
OUT = 2
MAX_BLOCK_ROWS = 256  # batch-tile rows (multiple of 8) for large B


def mlp_kernel(x_ref, w_ref, b_ref, o_ref):
    # x: (rows, 2400), w: (2, 2400) lane-dense.  Contract on the last dims of
    # both operands (no transpose of the weight in the wrapper or kernel).
    o_ref[...] = (
        lax.dot_general(
            x_ref[...],
            w_ref[...],
            dimension_numbers=(((1,), (1,)), ((), ())),
            preferred_element_type=jnp.float32,
        )
        + b_ref[...]
    )


def collapse_params(w1, b1, w3, b3):
    """Fold fc1 and fc3 into one linear.  Call ONCE at init time.

    Valid ONLY because there is no activation between fc1 and fc3 in NN.forward.

    w1: (100, 2400), b1: (100,), w3: (2, 100), b3: (2,)  -- torch Linear layout.
    Returns:
      w_eff_T: (2, 2400) f32, lane-dense (fast axis = 2400)
      b_eff:   (1, 2)    f32
    """
    w1 = w1.astype(jnp.float32)
    b1 = b1.astype(jnp.float32)
    w3 = w3.astype(jnp.float32)
    b3 = b3.astype(jnp.float32)
    w_eff_T = jnp.dot(w3, w1)                         # (2, 100) @ (100, 2400) -> (2, 2400)
    b_eff = (jnp.dot(w3, b1) + b3).reshape(1, OUT)    # (1, 2)
    return w_eff_T, b_eff


def nn_forward(x_nchw, w_eff_T, b_eff):
    """Pallas forward: x_nchw (B, C, H, W) with C*H*W == 2400 -> (B, 2)."""
    B = x_nchw.shape[0]
    x = x_nchw.astype(jnp.float32).reshape(B, -1)     # view(B, -1)
    assert x.shape[1] == IN_FEATURES

    # Batch tiling: full-batch block for small B, else 256-row blocks
    # (multiple of 8 sublanes).  Weight/bias blocks are grid-invariant ->
    # resident in VMEM across all grid steps.
    rows = B if B <= MAX_BLOCK_ROWS else MAX_BLOCK_ROWS
    grid = (pl.cdiv(B, rows),)

    cost = pl.CostEstimate(
        flops=2 * B * IN_FEATURES * OUT,
        transcendentals=0,
        bytes_accessed=4 * (B * IN_FEATURES + IN_FEATURES * OUT + OUT + B * OUT),
    )

    return pl.pallas_call(
        mlp_kernel,
        out_shape=jax.ShapeDtypeStruct((B, OUT), jnp.float32),
        grid=grid,
        in_specs=[
            pl.BlockSpec((rows, IN_FEATURES), lambda i: (i, 0)),
            pl.BlockSpec((OUT, IN_FEATURES), lambda i: (0, 0)),  # resident weight
            pl.BlockSpec((1, OUT), lambda i: (0, 0)),            # resident bias
        ],
        out_specs=pl.BlockSpec((rows, OUT), lambda i: (i, 0)),
        compiler_params=pltpu.CompilerParams(
            dimension_semantics=("parallel",),
        ),
        cost_estimate=cost,
    )(x, w_eff_T, b_eff)


def init_params(key):
    """Deterministic init mimicking nn.Linear default (uniform +-1/sqrt(fan_in))."""
    k1, k2, k3, k4 = jax.random.split(key, 4)
    bound1 = 1.0 / jnp.sqrt(IN_FEATURES)
    bound3 = 1.0 / jnp.sqrt(HIDDEN)
    w1 = jax.random.uniform(k1, (HIDDEN, IN_FEATURES), jnp.float32, -bound1, bound1)
    b1 = jax.random.uniform(k2, (HIDDEN,), jnp.float32, -bound1, bound1)
    w3 = jax.random.uniform(k3, (OUT, HIDDEN), jnp.float32, -bound3, bound3)
    b3 = jax.random.uniform(k4, (OUT,), jnp.float32, -bound3, bound3)
    return w1, b1, w3, b3


if __name__ == "__main__":
    key = jax.random.PRNGKey(0)
    kx, kp = jax.random.split(key)

    # (B, C, H, W) with C*H*W == 2400, matching the torch module's fc1 input.
    x = jax.random.normal(kx, (2, 4, 20, 30), dtype=jnp.float32)
    w1, b1, w3, b3 = init_params(kp)

    # One-time weight prep (outside the per-call hot path).
    w_eff_T, b_eff = collapse_params(w1, b1, w3, b3)
    w_eff_T, b_eff = jax.block_until_ready((w_eff_T, b_eff))

    out = nn_forward(x, w_eff_T, b_eff)
    out = jax.block_until_ready(out)

    # Reference check against the original two-layer math in plain JAX.
    x_flat = x.reshape(x.shape[0], -1)
    ref = (x_flat @ w1.T + b1) @ w3.T + b3
    assert out.shape == (2, 2)
    assert jnp.allclose(out, ref, atol=1e-4, rtol=1e-4)

    print("KERNEL_OK")
</pallas_src>

<mosaic_0001>
module attributes {stable_mosaic.version = 11 : i64} {
  func.func @mlp_kernel(%arg0: i32, %arg1: memref<2x2400xf32, #tpu.memory_space<vmem>>, %arg2: memref<2x2400xf32, #tpu.memory_space<vmem>>, %arg3: memref<1x2xf32, #tpu.memory_space<vmem>>, %arg4: memref<2x2xf32, #tpu.memory_space<vmem>>) attributes {dimension_semantics = [#tpu.dimension_semantics<parallel>], iteration_bounds = array<i64: 1>, scalar_prefetch = 0 : i64, scratch_operands = 0 : i64, tpu.core_type = #tpu.core_type<tc>, window_params = [{transform_indices = @transform_0, window_bounds = array<i64: 2, 2400>}, {pipeline_mode = #tpu.pipeline_mode<synchronous>, transform_indices = @transform_1, window_bounds = array<i64: 2, 2400>}, {pipeline_mode = #tpu.pipeline_mode<synchronous>, transform_indices = @transform_2, window_bounds = array<i64: 1, 2>}, {transform_indices = @transform_3, window_bounds = array<i64: 2, 2>}]} {
    %c0 = arith.constant 0 : index
    %c0_0 = arith.constant 0 : index
    %0 = vector.load %arg1[%c0, %c0_0] : memref<2x2400xf32, #tpu.memory_space<vmem>>, vector<2x2400xf32>
    %c0_1 = arith.constant 0 : index
    %c0_2 = arith.constant 0 : index
    %1 = vector.load %arg2[%c0_1, %c0_2] : memref<2x2400xf32, #tpu.memory_space<vmem>>, vector<2x2400xf32>
    %cst = arith.constant dense<0.000000e+00> : vector<2x2xf32>
    %2 = tpu.matmul %0, %1, %cst {dimension_numbers = #tpu.dot_dimension_numbers<[1], [1], [0], [0], [0, 0, 1, 0], [], []>} : vector<2x2400xf32>, vector<2x2400xf32>, vector<2x2xf32> -> vector<2x2xf32>
    %c0_3 = arith.constant 0 : index
    %c0_4 = arith.constant 0 : index
    %3 = vector.load %arg3[%c0_3, %c0_4] : memref<1x2xf32, #tpu.memory_space<vmem>>, vector<1x2xf32>
    %4 = vector.broadcast %3 : vector<1x2xf32> to vector<2x2xf32>
    %5 = arith.addf %2, %4 : vector<2x2xf32>
    %c0_5 = arith.constant 0 : index
    %c0_6 = arith.constant 0 : index
    %6 = vector.load %arg4[%c0_5, %c0_6] : memref<2x2xf32, #tpu.memory_space<vmem>>, vector<2x2xf32>
    tpu.vector_store %arg4[%c0_5, %c0_6], %5 {strides = array<i32>} : memref<2x2xf32, #tpu.memory_space<vmem>>, vector<2x2xf32>,
    return
  }
  func.func @transform_0(%arg0: i32) -> (i32, i32) {
    %c0_i32 = arith.constant 0 : i32
    %c0_i32_0 = arith.constant 0 : i32
    return %arg0, %c0_i32 : i32, i32
  }
  func.func @transform_1(%arg0: i32) -> (i32, i32) {
    %c0_i32 = arith.constant 0 : i32
    %c0_i32_0 = arith.constant 0 : i32
    %c0_i32_1 = arith.constant 0 : i32
    return %c0_i32, %c0_i32_0 : i32, i32
  }
  func.func @transform_2(%arg0: i32) -> (i32, i32) {
    %c0_i32 = arith.constant 0 : i32
    %c0_i32_0 = arith.constant 0 : i32
    %c0_i32_1 = arith.constant 0 : i32
    return %c0_i32, %c0_i32_0 : i32, i32
  }
  func.func @transform_3(%arg0: i32) -> (i32, i32) {
    %c0_i32 = arith.constant 0 : i32
    %c0_i32_0 = arith.constant 0 : i32
    return %arg0, %c0_i32 : i32, i32
  }
}

</mosaic_0001>

<bundles_post_ra>
// kernel: tpu_custom_call.1
= control target key start
LH: loop header
LB: loop body
LE: loop exit
PB: predicated region body
PF: predicated region fallthrough
CT: control target
= control target key end

     0   :  { %8 = vsyncpa [#allocation3], 0  ;;  %s1145_s0 = inlined_call_operand.hbm [shape: f32[2,2400], index: 0, kind: input, shape index: {}]   ;;  %s1146_s1 = inlined_call_operand.hbm [shape: f32[2,2400], index: 1, kind: input, shape index: {}]   ;;  %s1147_s2 = inlined_call_operand.vmem [shape: f32[1,2], index: 2, kind: input, shape index: {}]   ;;  %s1148_s3 = inlined_call_operand.hbm [shape: f32[2,2], index: 3, kind: output, shape index: {}]  }
   0x1   :  { %9 = vsyncpa [#allocation6], 0 }
   0x2   :  { %10 = vsyncpa [#allocation4], 0  ;;  %s1085_s12 = smov [#allocation2]   ;;  %s1086_s14 = smov [#allocation5]  }
   0x3   :  { %s17_s13 = sshll.u32 %s1085_s12, 4  ;;  %s27_s15 = sshll.u32 %s1086_s14, 4  ;;  %s18_s13 = int_to_ptr.vmem [resolvable:$true] %s17_s13  ;;  %s28_s15 = int_to_ptr.vmem [resolvable:$true] %s27_s15 }
   0x4   :  { %s1027_s16 = scalar_lea.vmem %s18_s13, 608  ;;  %p1032_p1 = scmp.lt.s32.totalorder %s18_s13, %s18_s13 }
   0x5   :  { %p1028_p0 = scmp.ne.s32.totalorder %s18_s13, %s1027_s16  ;;  %p1033_p2 = scmp.lt.s32.totalorder %s1027_s16, %s1027_s16 }
   0x7   :  { %p1034_p3 = por %p1033_p2, %p1032_p1 }
   0x9   :  { %p1035_p4 = pnand %p1034_p3, %p1028_p0 }
   0xb   :  { %1038 = shalt.err (!%p1035_p4)
}
   0xc   :  { %20 = dma.hbm_to_vmem [thread:$0]  %s1145_s0, 608, %s18_s13, [#allocation3]  }
   0xd   :  { %s1047_s19 = scalar_lea.vmem %s28_s15, 608  ;;  %p1052_p6 = scmp.lt.s32.totalorder %s28_s15, %s28_s15 }
   0xe   :  { %p1048_p5 = scmp.ne.s32.totalorder %s28_s15, %s1047_s19  ;;  %p1053_p7 = scmp.lt.s32.totalorder %s1047_s19, %s1047_s19 }
  0x10   :  { %p1054_p8 = por %p1053_p7, %p1052_p6 }
  0x12   :  { %p1055_p9 = pnand %p1054_p8, %p1048_p5 }
  0x14   :  { %1058 = shalt.err (!%p1055_p9)
}
  0x15   :  { %30 = dma.hbm_to_vmem [thread:$0]  %s1146_s1, 608, %s28_s15, [#allocation6]  }
  0x16   :  { %1079 = dma.done.wait [#allocation3], 608  }
  0x17   :  { %1080 = vsyncadd [#allocation3], 4294966688 }
  0x18   :  { %1081 = dma.done.wait [#allocation6], 608  }
  0x19   :  { %1082 = vsyncadd [#allocation6], 4294966688  ;;  %v65_v0 = vlaneseq  ;;  %v1087_v1 = vmov 1983009808   ;;  %v44_v6 = vld [vmem:[#allocation5] sm:$0xff]  ;;  %v45_v8 = vld [vmem:[#allocation5 + $0x8] sm:$0xff] }
  0x1a   :  { %v63_v2 = vunpack.c.l.s4 %v1087_v1  ;;  %v39_v7 = vld [vmem:[#allocation2] sm:$0xff]  ;;  %v168_v10 = vcombine.high %v44_v6, %v44_v6  ;;  %v40_v13 = vld [vmem:[#allocation2 + $0x8] sm:$0xff]  ;;  %v46_v14 = vld [vmem:[#allocation5 + $0x10] sm:$0xff]  ;;  %v185_v16 = vcombine.high %v45_v8, %v45_v8  ;;  %v1088_v63 = vmov 0.0  }
  0x1b   :  { %v66_v3 = vshrl.u32 %v65_v0, 7  ;;  %v61_v15 = vcombine.high %v39_v7, %v39_v7  ;;  %v41_v23 = vld [vmem:[#allocation2 + $0x10] sm:$0xff]  ;;  %v47_v24 = vld [vmem:[#allocation5 + $0x18] sm:$0xff]  ;;  %v78_v30 = vcombine.high %v40_v13, %v40_v13  ;;  %v202_v31 = vcombine.high %v46_v14, %v46_v14  ;;  %v48_v41 = vld [vmem:[#allocation5 + $0x20] sm:$0x3f] }
  0x1c   :  { %v64_v4 = vunpack.c.0.s8 %v63_v2  ;;  %v95_v38 = vcombine.high %v41_v23, %v41_v23  ;;  %v42_v39 = vld [vmem:[#allocation2 + $0x18] sm:$0xff]  ;;  %v219_v40 = vcombine.high %v47_v24, %v47_v24  ;;  %v43_v51 = vld [vmem:[#allocation2 + $0x20] sm:$0x3f]  ;;  %v236_v58 = vcombine.high %v48_v41, %v48_v41 }
  0x1d   :  { %v112_v50 = vcombine.high %v42_v39, %v42_v39  ;;  %v129_v61 = vcombine.high %v43_v51, %v43_v51  ;;  %vm270_vm0 = vcmask 785408   ;;  %vm1089_vm1 = vmmov 0   ;;  %v993_v1 = vld [vmem:[%s1147_s2] ss:$0 sm:$0xff]  ;;  %s1090_s2 = smov [#allocation7]  }
  0x1e   :  { %v1117_v5 = vsub.s32 %v64_v4, %v66_v3  ;;  %s983_s22 = sshll.u32 %s1090_s2, 4  ;;  %vm975_vm2 = vcmask 9216   ;;  %s984_s22 = int_to_ptr.vmem [resolvable:$true] %s983_s22 }
  0x1f   :  { %s1059_s23 = scalar_lea.vmem %s984_s22, 32  ;;  %p1064_p11 = scmp.lt.s32.totalorder %s984_s22, %s984_s22 }
  0x20   :  { %v175_v9 = vrot.slane %v44_v6, %v1117_v5  ;;  %v68_v11 = vrot.slane %v39_v7, %v1117_v5  ;;  %v192_v12 = vrot.slane %v45_v8, %v1117_v5  ;;  %v85_v17 = vrot.slane %v40_v13, %v1117_v5  ;;  %p1060_p10 = scmp.ne.s32.totalorder %s984_s22, %s1059_s23  ;;  %p1065_p12 = scmp.lt.s32.totalorder %s1059_s23, %s1059_s23 }
  0x21   :  { %v209_v18 = vrot.slane %v46_v14, %v1117_v5  ;;  %v182_v20 = vrot.slane %v168_v10, %v1117_v5  ;;  %v75_v25 = vrot.slane %v61_v15, %v1117_v5  ;;  %v199_v26 = vrot.slane %v185_v16, %v1117_v5 }
  0x22   :  { %v183_v19 = vcombine.high %v175_v9, %v175_v9  ;;  %v76_v21 = vcombine.high %v68_v11, %v68_v11  ;;  %v200_v22 = vcombine.high %v192_v12, %v192_v12  ;;  %v93_v27 = vcombine.high %v85_v17, %v85_v17  ;;  %p1066_p13 = por %p1065_p12, %p1064_p11 }
  0x23   :  { %v217_v28 = vcombine.high %v209_v18, %v209_v18  ;;  %v184_v29 = vcombine.high %v182_v20, %v182_v20  ;;  %v77_v32 = vcombine.high %v75_v25, %v75_v25  ;;  %v201_v33 = vcombine.high %v199_v26, %v199_v26 }
  0x24   :  { %305 = vmatprep.subr.mxu0 %v183_v19  ;;  %339 = vmatprep.mubr.f32.mxu0 %v76_v21  ;;  %v102_v34 = vrot.slane %v41_v23, %v1117_v5  ;;  %v226_v35 = vrot.slane %v47_v24, %v1117_v5  ;;  %v92_v36 = vrot.slane %v78_v30, %v1117_v5  ;;  %p1067_p0 = pnand %p1066_p13, %p1060_p10 }
  0x25   :  { %306 = vmatpush1.xpose.msra.mxu0 %v175_v9  ;;  %375 = vmatprep.subr.mxu1 %v184_v29  ;;  %v216_v37 = vrot.slane %v202_v31, %v1117_v5  ;;  %v109_v44 = vrot.slane %v95_v38, %v1117_v5  ;;  %v233_v46 = vrot.slane %v219_v40, %v1117_v5 }
  0x26   :  { %445 = vmatprep.subr.mxu0 %v200_v22  ;;  %376 = vmatpush1.xpose.msra.mxu1 %v182_v20  ;;  %v94_v42 = vcombine.high %v92_v36, %v92_v36  ;;  %v110_v45 = vcombine.high %v102_v34, %v102_v34  ;;  %v119_v47 = vrot.slane %v42_v39, %v1117_v5 }
  0x27   :  { %409 = vmatprep.mubr.f32.mxu1 %v77_v32  ;;  %515 = vmatprep.subr.mxu1 %v201_v33  ;;  %v218_v43 = vcombine.high %v216_v37, %v216_v37  ;;  %v234_v48 = vcombine.high %v226_v35, %v226_v35  ;;  %v243_v49 = vrot.slane %v48_v41, %v1117_v5 }
  0x28   :  { %340 = vmatmul.mubr.f32.vlgmr.msra.gmra.mxu0 %v68_v11  ;;  %v111_v52 = vcombine.high %v109_v44, %v109_v44  ;;  %v235_v53 = vcombine.high %v233_v46, %v233_v46  ;;  %v126_v54 = vrot.slane %v112_v50, %v1117_v5  ;;  %v127_v55 = vcombine.high %v119_v47, %v119_v47 }
  0x29   :  { %446 = vmatpush1.xpose.msra.mxu0 %v192_v12  ;;  %479 = vmatprep.mubr.f32.mxu0 %v93_v27  ;;  %v136_v56 = vrot.slane %v43_v51, %v1117_v5  ;;  %v251_v57 = vcombine.high %v243_v49, %v243_v49  ;;  %v250_v62 = vrot.slane %v236_v58, %v1117_v5 }
  0x2a   :  { %410 = vmatmul.mubr.f32.vlgmr.msra.gmra.mxu1 %v75_v25  ;;  %585 = vmatprep.subr.mxu0 %v217_v28  ;;  %v128_v59 = vcombine.high %v126_v54, %v126_v54  ;;  %v143_v0 = vrot.slane %v129_v61, %v1117_v5 }
  0x2b   :  { %516 = vmatpush1.xpose.msra.mxu1 %v199_v26  ;;  %549 = vmatprep.mubr.f32.mxu1 %v94_v42  ;;  %v144_v60 = vcombine.high %v136_v56, %v136_v56 }
  0x2c   :  { %480 = vmatmul.mubr.f32.vlgmr.msra.gmra.mxu0 %v85_v17  ;;  %655 = vmatprep.subr.mxu1 %v218_v43 }
  0x2d   :  { %586 = vmatpush1.xpose.msra.mxu0 %v209_v18  ;;  %619 = vmatprep.mubr.f32.mxu0 %v110_v45 }
  0x2e   :  { %550 = vmatmul.mubr.f32.vlgmr.msra.gmra.mxu1 %v92_v36  ;;  %725 = vmatprep.subr.mxu0 %v234_v48 }
  0x2f   :  { %656 = vmatpush1.xpose.msra.mxu1 %v216_v37  ;;  %689 = vmatprep.mubr.f32.mxu1 %v111_v52 }
  0x30   :  { %620 = vmatmul.mubr.f32.vlgmr.msra.gmra.mxu0 %v102_v34  ;;  %795 = vmatprep.subr.mxu1 %v235_v53 }
  0x31   :  { %726 = vmatpush1.xpose.msra.mxu0 %v226_v35  ;;  %759 = vmatprep.mubr.f32.mxu0 %v127_v55 }
  0x32   :  { %690 = vmatmul.mubr.f32.vlgmr.msra.gmra.mxu1 %v109_v44  ;;  %865 = vmatprep.subr.mxu0 %v251_v57 }
  0x33   :  { %796 = vmatpush1.xpose.msra.mxu1 %v233_v46  ;;  %829 = vmatprep.mubr.f32.mxu1 %v128_v59 }
  0x34   :  { %760 = vmatmul.mubr.f32.vlgmr.msra.gmra.mxu0 %v119_v47  ;;  %998 = vmatprep.subr.mxu1 %v1088_v63 }
  0x35   :  { %866 = vmatpush1.xpose.msra.mxu0 %v243_v49  ;;  %899 = vmatprep.mubr.f32.mxu0 %v144_v60 }
  0x36   :  { %830 = vmatmul.mubr.f32.vlgmr.msra.gmra.mxu1 %v126_v54 }
  0x37   :  { %999 = vmatpush3.xpose.msk.msra.mxu1 %vm270_vm0, %v250_v62  ;;  %1000 = vmatprep.mubr.msk.f32.mxu1 %vm1089_vm1, %v1088_v63 }
  0x38   :  { %900 = vmatmul.mubr.f32.vlgmr.msra.gmra.mxu0 %v136_v56 }
  0x3a   :  { %1001 = vmatmul.mubr.msk.f32.vlgmr.msra.gmra.mxu1 %vm270_vm0, %v143_v0 }
  0xe8   :  { %v341_v2 = vpop.f32.mrf.mxu0 }
  0xe9   :  { %v342_v3 = vadd.f32 %v993_v1, %v341_v2 }
  0xea   :  { %v343_v4 = vpop.f32.mrf.mxu0  ;;  %v411_v6 = vpop.f32.mrf.mxu1 }
  0xeb   :  { %v412_v7 = vadd.f32 %v411_v6, %v342_v3 }
  0xec   :  { %v413_v8 = vpop.f32.mrf.mxu1  ;;  %v481_v9 = vpop.f32.mrf.mxu0 }
  0xed   :  { %v482_v10 = vadd.f32 %v481_v9, %v412_v7 }
  0xee   :  { %v483_v11 = vpop.f32.mrf.mxu0  ;;  %v551_v12 = vpop.f32.mrf.mxu1 }
  0xef   :  { %v552_v5 = vadd.f32 %v551_v12, %v482_v10 }
  0xf0   :  { %v553_v13 = vpop.f32.mrf.mxu1  ;;  %v621_v14 = vpop.f32.mrf.mxu0 }
  0xf1   :  { %v622_v15 = vadd.f32 %v621_v14, %v552_v5 }
  0xf2   :  { %v623_v16 = vpop.f32.mrf.mxu0  ;;  %v691_v17 = vpop.f32.mrf.mxu1 }
  0xf3   :  { %v692_v18 = vadd.f32 %v691_v17, %v622_v15 }
  0xf4   :  { %v693_v19 = vpop.f32.mrf.mxu1  ;;  %v761_v20 = vpop.f32.mrf.mxu0 }
  0xf5   :  { %v762_v21 = vadd.f32 %v761_v20, %v692_v18 }
  0xf6   :  { %v763_v22 = vpop.f32.mrf.mxu0  ;;  %v831_v23 = vpop.f32.mrf.mxu1 }
  0xf7   :  { %v832_v24 = vadd.f32 %v831_v23, %v762_v21 }
  0xf8   :  { %v833_v25 = vpop.f32.mrf.mxu1  ;;  %v901_v26 = vpop.f32.mrf.mxu0 }
  0xf9   :  { %v902_v27 = vadd.f32 %v901_v26, %v832_v24 }
  0xfa   :  { %v903_v28 = vpop.f32.mrf.mxu0  ;;  %v971_v29 = vpop.f32.mrf.mxu1 }
  0xfb   :  { %v972_v30 = vadd.f32 %v971_v29, %v902_v27 }
  0xfc   :  { %v1002_v31 = vpop.f32.mrf.mxu1 }
  0xfd   :  { %976 = vst.msk [vmem:[#allocation7] sm:$0x3] %vm975_vm2, %v972_v30 }
  0xfe   :  { %1070 = shalt.err (!%p1067_p0)
}
  0xff   :  { %986 = dma.vmem_to_hbm [thread:$0]  %s984_s22, 32, %s1148_s3, [#allocation4]  }
 0x100   :  { %1083 = dma.done.wait [#allocation4], 32  }
 0x101   :  { %1084 = vsyncadd [#allocation4], 4294967264 }
 0x102   :  { %990 = vsyncpa [#allocation3], 1 }
 0x103   :  { %991 = vsyncpa [#allocation6], 1 }
 0x104   :  { %992 = vsyncpa [#allocation4], 1 }

</bundles_post_ra>
